<compile_context>
chip_gen: v6e
topology: v6e:2x2x1
jax: 0.10.0
libtpu: 0.0.40
codegen_flags: <defaults>
</compile_context>

<pallas_src>
import jax
import jax.numpy as jnp
from jax.experimental import pallas as pl
from jax.experimental.pallas import tpu as pltpu

_LANES = 128  # TPU vreg lane count; batch is padded to a multiple of this.


def _mlp_t_kernel(xT_ref, w1t_ref, b1_ref, w2t_ref, b2_ref, w3t_ref, b3_ref,
                  o_ref):
    """Fused transposed 3-layer MLP on one batch tile (batch on lanes).

    xT_ref : (in_dim, TILE_B)   compute_dtype
    w1t_ref: (hidden, in_dim)   compute_dtype     b1_ref: (hidden, 1) f32
    w2t_ref: (h2, hidden)       compute_dtype     b2_ref: (h2, 1)     f32
    w3t_ref: (1, h2)            compute_dtype     b3_ref: (1, 1)      f32 SMEM
    o_ref  : (1, TILE_B)        f32  (lane-dense, unmasked store)
    """
    xT = xT_ref[...]

    # Layer 1: Linear(input_size -> hidden) + ReLU   (Dropout(0.2) = identity)
    h1 = jnp.dot(w1t_ref[...], xT, preferred_element_type=jnp.float32)
    h1 = jnp.maximum(h1 + b1_ref[...], 0.0)                 # (hidden, TILE_B)

    # Layer 2: Linear(hidden -> hidden//2) + ReLU    (Dropout(0.1) = identity)
    h1 = h1.astype(w2t_ref.dtype)
    h2 = jnp.dot(w2t_ref[...], h1, preferred_element_type=jnp.float32)
    h2 = jnp.maximum(h2 + b2_ref[...], 0.0)                  # (h2, TILE_B)

    # Layer 3: Linear(hidden//2 -> 1); result is a single lane-dense row.
    h2 = h2.astype(w3t_ref.dtype)
    y = jnp.dot(w3t_ref[...], h2, preferred_element_type=jnp.float32)
    o_ref[...] = (y + b3_ref[0, 0]).astype(o_ref.dtype)      # (1, TILE_B)


def _round_up(n, m):
    return ((n + m - 1) // m) * m


def prepare_params(params, compute_dtype=jnp.bfloat16):
    """Transpose/cast weights ONCE (not per forward call).

    params: dict with w1 (in,h), b1 (1,h), w2 (h,h2), b2 (1,h2),
            w3 (h2,1), b3 (1,1), all float32.
    """
    return {
        "w1t": params["w1"].T.astype(compute_dtype),          # (hidden, in)
        "b1c": params["b1"].reshape(-1, 1).astype(jnp.float32),  # (hidden, 1)
        "w2t": params["w2"].T.astype(compute_dtype),          # (h2, hidden)
        "b2c": params["b2"].reshape(-1, 1).astype(jnp.float32),  # (h2, 1)
        "w3t": params["w3"].T.astype(compute_dtype),          # (1, h2)
        "b3s": params["b3"].reshape(1, 1).astype(jnp.float32),   # SMEM scalar
        "compute_dtype": compute_dtype,
    }


def stock_price_predictor_forward(x, prepared, *, tile_b=1024):
    """Run the fused transposed-MLP Pallas kernel.

    x: (B, input_size) float32
    prepared: output of prepare_params()
    tile_b: batch-tile size in lanes (rounded to a multiple of 128)
    returns: (B, 1) float32
    """
    cd = prepared["compute_dtype"]
    w1t, b1c = prepared["w1t"], prepared["b1c"]
    w2t, b2c = prepared["w2t"], prepared["b2c"]
    w3t, b3s = prepared["w3t"], prepared["b3s"]

    B, in_dim = x.shape
    hidden = w1t.shape[0]
    h2_dim = w2t.shape[0]

    # Batch tile: multiple of the lane count, capped to the padded batch and,
    # for b_pad >= 256, to half of it so the grid has >= 2 steps (v7x 2 TCs).
    b128 = _round_up(B, _LANES)
    tile_b = max(_LANES, _round_up(min(tile_b, b128), _LANES))
    if b128 >= 2 * _LANES:
        tile_b = min(tile_b, max(_LANES, (b128 // 2) // _LANES * _LANES))
    b_pad = _round_up(b128, tile_b)
    num_tiles = b_pad // tile_b

    # x^T: (in_dim, b_pad), batch on lanes, cast to the MXU compute dtype.
    xT = jnp.pad(x, ((0, b_pad - B), (0, 0))).T.astype(cd)

    itemsize = jnp.dtype(cd).itemsize
    flops = 2 * b_pad * (in_dim * hidden + hidden * h2_dim + h2_dim * 1)
    bytes_accessed = (
        (b_pad * in_dim + in_dim * hidden + hidden * h2_dim + h2_dim) * itemsize
        + (hidden + h2_dim + 1) * 4   # f32 biases
        + b_pad * 4                   # f32 output (one value per row)
    )

    out_t = pl.pallas_call(
        _mlp_t_kernel,
        out_shape=jax.ShapeDtypeStruct((1, b_pad), jnp.float32),
        grid=(num_tiles,),
        in_specs=[
            pl.BlockSpec((in_dim, tile_b), lambda i: (0, i)),   # x^T: batch-tiled
            pl.BlockSpec((hidden, in_dim), lambda i: (0, 0)),   # W1^T (resident)
            pl.BlockSpec((hidden, 1), lambda i: (0, 0)),        # b1
            pl.BlockSpec((h2_dim, hidden), lambda i: (0, 0)),   # W2^T
            pl.BlockSpec((h2_dim, 1), lambda i: (0, 0)),        # b2
            pl.BlockSpec((1, h2_dim), lambda i: (0, 0)),        # W3^T
            pl.BlockSpec(memory_space=pltpu.MemorySpace.SMEM),  # b3 scalar
        ],
        out_specs=pl.BlockSpec((1, tile_b), lambda i: (0, i)),
        compiler_params=pltpu.CompilerParams(
            dimension_semantics=("parallel",),
        ),
        cost_estimate=pl.CostEstimate(
            flops=flops, transcendentals=0, bytes_accessed=bytes_accessed),
    )(xT, w1t, b1c, w2t, b2c, w3t, b3s)

    # (1, b_pad) -> (B, 1): keep real batch rows only.
    return out_t[:, :B].T


def init_params(key, input_size, hidden_size):
    """Deterministic init mimicking PyTorch nn.Linear defaults:
    U(-1/sqrt(fan_in), 1/sqrt(fan_in)) for both weights and biases."""
    h2 = hidden_size // 2
    keys = jax.random.split(key, 6)

    def linear(kw, kb, fan_in, fan_out):
        bound = 1.0 / jnp.sqrt(jnp.float32(fan_in))
        w = jax.random.uniform(kw, (fan_in, fan_out), jnp.float32, -bound, bound)
        b = jax.random.uniform(kb, (1, fan_out), jnp.float32, -bound, bound)
        return w, b

    w1, b1 = linear(keys[0], keys[1], input_size, hidden_size)
    w2, b2 = linear(keys[2], keys[3], hidden_size, h2)
    w3, b3 = linear(keys[4], keys[5], h2, 1)
    return {"w1": w1, "b1": b1, "w2": w2, "b2": b2, "w3": w3, "b3": b3}


def reference_forward(x, p):
    """Pure-JAX reference for correctness checking (eval-mode dropout)."""
    h1 = jnp.maximum(x @ p["w1"] + p["b1"], 0.0)
    h2 = jnp.maximum(h1 @ p["w2"] + p["b2"], 0.0)
    return h2 @ p["w3"] + p["b3"]


if __name__ == "__main__":
    key = jax.random.PRNGKey(0)
    k_params, k_x = jax.random.split(key)

    batch = 8
    input_size = 16
    hidden_size = 64

    params = init_params(k_params, input_size, hidden_size)
    x = jax.random.normal(k_x, (batch, input_size), dtype=jnp.float32)
    y_ref = reference_forward(x, params)

    # f32 MXU path: near-exact match against the pure-JAX reference.
    prep_f32 = prepare_params(params, compute_dtype=jnp.float32)
    y_f32 = jax.block_until_ready(stock_price_predictor_forward(x, prep_f32))
    assert y_f32.shape == (batch, 1), y_f32.shape
    assert jnp.allclose(y_f32, y_ref, atol=1e-4, rtol=1e-4), "f32 kernel mismatch"

    # Default bf16 MXU-operand path (f32 accumulation): relaxed tolerance.
    # Expected error grows with input_size/hidden (bf16 ~0.4% relative/operand).
    prep_bf16 = prepare_params(params)  # compute_dtype defaults to bfloat16
    y_bf16 = jax.block_until_ready(stock_price_predictor_forward(x, prep_bf16))
    assert y_bf16.shape == (batch, 1), y_bf16.shape
    assert jnp.allclose(y_bf16, y_ref, atol=5e-2, rtol=5e-2), "bf16 kernel mismatch"

    print("KERNEL_OK")
</pallas_src>

<mosaic_0001>
module attributes {stable_mosaic.version = 11 : i64} {
  func.func @_mlp_t_kernel(%arg0: i32, %arg1: memref<16x128xf32, #tpu.memory_space<vmem>>, %arg2: memref<64x16xf32, #tpu.memory_space<vmem>>, %arg3: memref<64x1xf32, #tpu.memory_space<vmem>>, %arg4: memref<32x64xf32, #tpu.memory_space<vmem>>, %arg5: memref<32x1xf32, #tpu.memory_space<vmem>>, %arg6: memref<1x32xf32, #tpu.memory_space<vmem>>, %arg7: memref<1x1xf32, #tpu.memory_space<smem>>, %arg8: memref<1x128xf32, #tpu.memory_space<vmem>>) attributes {dimension_semantics = [#tpu.dimension_semantics<parallel>], iteration_bounds = array<i64: 1>, scalar_prefetch = 0 : i64, scratch_operands = 0 : i64, tpu.core_type = #tpu.core_type<tc>, window_params = [{transform_indices = @transform_0, window_bounds = array<i64: 16, 128>}, {pipeline_mode = #tpu.pipeline_mode<synchronous>, transform_indices = @transform_1, window_bounds = array<i64: 64, 16>}, {pipeline_mode = #tpu.pipeline_mode<synchronous>, transform_indices = @transform_2, window_bounds = array<i64: 64, 1>}, {pipeline_mode = #tpu.pipeline_mode<synchronous>, transform_indices = @transform_3, window_bounds = array<i64: 32, 64>}, {pipeline_mode = #tpu.pipeline_mode<synchronous>, transform_indices = @transform_4, window_bounds = array<i64: 32, 1>}, {pipeline_mode = #tpu.pipeline_mode<synchronous>, transform_indices = @transform_5, window_bounds = array<i64: 1, 32>}, {transform_indices = @transform_6, window_bounds = array<i64: 1, 1>}, {transform_indices = @transform_7, window_bounds = array<i64: 1, 128>}]} {
    %c0 = arith.constant 0 : index
    %c0_0 = arith.constant 0 : index
    %0 = vector.load %arg1[%c0, %c0_0] : memref<16x128xf32, #tpu.memory_space<vmem>>, vector<16x128xf32>
    %c0_1 = arith.constant 0 : index
    %c0_2 = arith.constant 0 : index
    %1 = vector.load %arg2[%c0_1, %c0_2] : memref<64x16xf32, #tpu.memory_space<vmem>>, vector<64x16xf32>
    %cst = arith.constant dense<0.000000e+00> : vector<64x128xf32>
    %2 = tpu.matmul %1, %0, %cst {dimension_numbers = #tpu.dot_dimension_numbers<[1], [0], [0], [1], [0, 0, 1, 1], [], []>} : vector<64x16xf32>, vector<16x128xf32>, vector<64x128xf32> -> vector<64x128xf32>
    %c0_3 = arith.constant 0 : index
    %c0_4 = arith.constant 0 : index
    %3 = vector.load %arg3[%c0_3, %c0_4] : memref<64x1xf32, #tpu.memory_space<vmem>>, vector<64x1xf32>
    %4 = vector.broadcast %3 : vector<64x1xf32> to vector<64x128xf32>
    %5 = arith.addf %2, %4 : vector<64x128xf32>
    %cst_5 = arith.constant 0.000000e+00 : f32
    %6 = vector.broadcast %cst_5 : f32 to vector<64x128xf32>
    %7 = arith.maximumf %5, %6 : vector<64x128xf32>
    %c0_6 = arith.constant 0 : index
    %c0_7 = arith.constant 0 : index
    %8 = vector.load %arg4[%c0_6, %c0_7] : memref<32x64xf32, #tpu.memory_space<vmem>>, vector<32x64xf32>
    %cst_8 = arith.constant dense<0.000000e+00> : vector<32x128xf32>
    %9 = tpu.matmul %8, %7, %cst_8 {dimension_numbers = #tpu.dot_dimension_numbers<[1], [0], [0], [1], [0, 0, 1, 1], [], []>} : vector<32x64xf32>, vector<64x128xf32>, vector<32x128xf32> -> vector<32x128xf32>
    %c0_9 = arith.constant 0 : index
    %c0_10 = arith.constant 0 : index
    %10 = vector.load %arg5[%c0_9, %c0_10] : memref<32x1xf32, #tpu.memory_space<vmem>>, vector<32x1xf32>
    %11 = vector.broadcast %10 : vector<32x1xf32> to vector<32x128xf32>
    %12 = arith.addf %9, %11 : vector<32x128xf32>
    %cst_11 = arith.constant 0.000000e+00 : f32
    %13 = vector.broadcast %cst_11 : f32 to vector<32x128xf32>
    %14 = arith.maximumf %12, %13 : vector<32x128xf32>
    %c0_12 = arith.constant 0 : index
    %c0_13 = arith.constant 0 : index
    %15 = vector.load %arg6[%c0_12, %c0_13] : memref<1x32xf32, #tpu.memory_space<vmem>>, vector<1x32xf32>
    %cst_14 = arith.constant dense<0.000000e+00> : vector<1x128xf32>
    %16 = tpu.matmul %15, %14, %cst_14 {dimension_numbers = #tpu.dot_dimension_numbers<[1], [0], [0], [1], [0, 0, 1, 1], [], []>} : vector<1x32xf32>, vector<32x128xf32>, vector<1x128xf32> -> vector<1x128xf32>
    %c0_15 = arith.constant 0 : index
    %c0_16 = arith.constant 0 : index
    %17 = memref.load %arg7[%c0_15, %c0_16] : memref<1x1xf32, #tpu.memory_space<smem>>
    %18 = vector.broadcast %17 : f32 to vector<1x128xf32>
    %19 = arith.addf %16, %18 : vector<1x128xf32>
    %c0_17 = arith.constant 0 : index
    %c0_18 = arith.constant 0 : index
    %20 = vector.load %arg8[%c0_17, %c0_18] : memref<1x128xf32, #tpu.memory_space<vmem>>, vector<1x128xf32>
    tpu.vector_store %arg8[%c0_17, %c0_18], %19 {strides = array<i32>} : memref<1x128xf32, #tpu.memory_space<vmem>>, vector<1x128xf32>,
    return
  }
  func.func @transform_0(%arg0: i32) -> (i32, i32) {
    %c0_i32 = arith.constant 0 : i32
    %c0_i32_0 = arith.constant 0 : i32
    return %c0_i32, %arg0 : i32, i32
  }
  func.func @transform_1(%arg0: i32) -> (i32, i32) {
    %c0_i32 = arith.constant 0 : i32
    %c0_i32_0 = arith.constant 0 : i32
    %c0_i32_1 = arith.constant 0 : i32
    return %c0_i32, %c0_i32_0 : i32, i32
  }
  func.func @transform_2(%arg0: i32) -> (i32, i32) {
    %c0_i32 = arith.constant 0 : i32
    %c0_i32_0 = arith.constant 0 : i32
    %c0_i32_1 = arith.constant 0 : i32
    return %c0_i32, %c0_i32_0 : i32, i32
  }
  func.func @transform_3(%arg0: i32) -> (i32, i32) {
    %c0_i32 = arith.constant 0 : i32
    %c0_i32_0 = arith.constant 0 : i32
    %c0_i32_1 = arith.constant 0 : i32
    return %c0_i32, %c0_i32_0 : i32, i32
  }
  func.func @transform_4(%arg0: i32) -> (i32, i32) {
    %c0_i32 = arith.constant 0 : i32
    %c0_i32_0 = arith.constant 0 : i32
    %c0_i32_1 = arith.constant 0 : i32
    return %c0_i32, %c0_i32_0 : i32, i32
  }
  func.func @transform_5(%arg0: i32) -> (i32, i32) {
    %c0_i32 = arith.constant 0 : i32
    %c0_i32_0 = arith.constant 0 : i32
    %c0_i32_1 = arith.constant 0 : i32
    return %c0_i32, %c0_i32_0 : i32, i32
  }
  func.func @transform_6(%arg0: i32) -> (i32, i32) {
    %c0_i32 = arith.constant 0 : i32
    %c0_i32_0 = arith.constant 0 : i32
    %c0_i32_1 = arith.constant 0 : i32
    return %c0_i32, %c0_i32_0 : i32, i32
  }
  func.func @transform_7(%arg0: i32) -> (i32, i32) {
    %c0_i32 = arith.constant 0 : i32
    %c0_i32_0 = arith.constant 0 : i32
    return %c0_i32, %arg0 : i32, i32
  }
}

</mosaic_0001>

<bundles_post_ra>
// kernel: tpu_custom_call.1
= control target key start
LH: loop header
LB: loop body
LE: loop exit
PB: predicated region body
PF: predicated region fallthrough
CT: control target
= control target key end

     0   :  { %vm86_vm0 = vcmask 130048   ;;  %v563_v4 = vmov 0   ;;  %s706_s0 = inlined_call_operand.vmem [shape: f32[16,128], index: 0, kind: input, shape index: {}]   ;;  %s707_s1 = inlined_call_operand.vmem [shape: f32[64,16], index: 1, kind: input, shape index: {}]   ;;  %s708_s2 = inlined_call_operand.vmem [shape: f32[64,1], index: 2, kind: input, shape index: {}]   ;;  %s709_s3 = inlined_call_operand.vmem [shape: f32[32,64], index: 3, kind: input, shape index: {}]   ;;  %s710_s4 = inlined_call_operand.vmem [shape: f32[32,1], index: 4, kind: input, shape index: {}]   ;;  %s711_s5 = inlined_call_operand.vmem [shape: f32[1,32], index: 5, kind: input, shape index: {}]   ;;  %s712_s6 = inlined_call_operand.<no memory space> [shape: f32[1,1], index: 6, kind: input, shape index: {}]   ;;  %s713_s7 = inlined_call_operand.hbm [shape: f32[1,128], index: 7, kind: output, shape index: {}]  }
   0x1   :  { %v29_v0 = vld [vmem:[%s706_s0 + $0x8] sm:$0xff]  ;;  %v28_v1 = vld [vmem:[%s706_s0] sm:$0xff]  ;;  %539 = vset.pattern.permute.xlu0 %v563_v4  ;;  %v32_v5 = vld [vmem:[%s707_s1 + $0x10] sm:$0xff]  ;;  %540 = vset.pattern.permute.xlu1 %v563_v4 }
   0x2   :  { %v30_v2 = vld [vmem:[%s707_s1] sm:$0xff]  ;;  %486 = vmatprep.subr.mxu0 %v29_v0  ;;  %v31_v3 = vld [vmem:[%s707_s1 + $0x8] sm:$0xff]  ;;  %v45_v6 = vld [vmem:[%s708_s2 + $0x38] sm:$0xff] }
   0x3   :  { %490 = vmatprep.mubr.msk.f32.mxu0 %vm86_vm0, %v30_v2  ;;  %487 = vmatpush3.msra.mxu0 %v29_v0  ;;  %v43_v7 = vld [vmem:[%s708_s2 + $0x28] sm:$0xff]  ;;  %v44_v8 = vld [vmem:[%s708_s2 + $0x30] sm:$0xff]  ;;  %v33_v9 = vld [vmem:[%s707_s1 + $0x18] sm:$0xff] }
   0x4   :  { %488 = vmatprep.subr.mxu0 %v28_v1  ;;  %83 = vperm.xlu0 %539, %v45_v6   ;;  %v42_v10 = vld [vmem:[%s708_s2 + $0x20] sm:$0xff] }
   0x5   :  { %489 = vmatpush3.msra.mxu0 %v28_v1  ;;  %73 = vperm.xlu1 %540, %v43_v7   ;;  %v34_v11 = vld [vmem:[%s707_s1 + $0x20] sm:$0xff] }
   0x6   :  { %491 = vmatmul.mubr.msk.f32.vlgmr.msra.gmra.mxu0 %vm86_vm0, %v31_v3 }
   0x7   :  { %493 = vmatprep.mubr.msk.f32.mxu0 %vm86_vm0, %v32_v5 }
   0x8   :  { %13 = vsyncpa [#allocation4], 0  ;;  %78 = vperm.xlu0 %539, %v44_v8   ;;  %v41_v12 = vld [vmem:[%s708_s2 + $0x18] sm:$0xff]  ;;  %v35_v13 = vld [vmem:[%s707_s1 + $0x28] sm:$0xff]  ;;  %vm252_vm1 = vcmask 523264   ;;  %v564_v59 = vmov 0.0  }
   0x9   :  { %68 = vperm.xlu1 %540, %v42_v10   ;;  %v40_v14 = vld [vmem:[%s708_s2 + $0x10] sm:$0xff]  ;;  %v39_v16 = vld [vmem:[%s708_s2 + $0x8] sm:$0xff]  ;;  %v37_v17 = vld [vmem:[%s707_s1 + $0x38] sm:$0xff]  ;;  %524 = vmatprep.subr.mxu0 %v564_v59  ;;  %vm565_vm2 = vmmov 0   ;;  %vm357_vm3 = vcmask 261120   ;;  %s566_s28 = smov [#allocation3]  }
   0xa   :  { %494 = vmatmul.mubr.msk.f32.gmra.mxu0 %vm86_vm0, %v33_v9  ;;  %v36_v15 = vld [vmem:[%s707_s1 + $0x30] sm:$0xff]  ;;  %v38_v18 = vld [vmem:[%s708_s2] sm:$0xff]  ;;  %v231_v19 = vld [vmem:[%s710_s4 + $0x18] sm:$0xff]  ;;  %s438_s29 = sshll.u32 %s566_s28, 4  ;;  %s439_s29 = int_to_ptr.vmem [resolvable:$true] %s438_s29 }
   0xb   :  { %496 = vmatprep.mubr.msk.f32.mxu0 %vm86_vm0, %v34_v11  ;;  %v230_v20 = vld [vmem:[%s710_s4 + $0x10] sm:$0xff]  ;;  %v229_v21 = vld [vmem:[%s710_s4 + $0x8] sm:$0xff]  ;;  %v228_v22 = vld [vmem:[%s710_s4] sm:$0xff]  ;;  %s541_s30 = scalar_lea.vmem %s439_s29, 16  ;;  %s545_s8 = scalar_lea.vmem %s439_s29, 32 }
   0xc   :  { %63 = vperm.xlu0 %539, %v41_v12   ;;  %v224_v23 = vld [vmem:[%s709_s3] sm:$0xff]  ;;  %v225_v56 = vld [vmem:[%s709_s3 + $0x8] sm:$0xff]  ;;  %v226_v57 = vld [vmem:[%s709_s3 + $0x10] sm:$0xff]  ;;  %p542_p0 = scmp.ne.s32.totalorder %s439_s29, %s541_s30  ;;  %p546_p1 = scmp.lt.s32.totalorder %s439_s29, %s439_s29 }
   0xd   :  { %58 = vperm.xlu1 %540, %v40_v14   ;;  %518 = vmatprep.mubr.msk.f32.mxu1 %vm252_vm1, %v224_v23  ;;  %v227_v58 = vld [vmem:[%s709_s3 + $0x18] sm:$0xff]  ;;  %v354_v12 = vld [vmem:[%s711_s5] sm:$0x1]  ;;  %p547_p2 = scmp.lt.s32.totalorder %s545_s8, %s541_s30 }
   0xe   :  { %497 = vmatmul.mubr.msk.f32.gmra.mxu0 %vm86_vm0, %v35_v13  ;;  %v356_v13 = vstv %s712_s6 }
   0xf   :  { %499 = vmatprep.mubr.msk.f32.mxu0 %vm86_vm0, %v36_v15  ;;  %p548_p3 = por %p547_p2, %p546_p1 }
  0x10   :  { %53 = vperm.xlu0 %539, %v39_v16  }
  0x11   :  { %48 = vperm.xlu1 %540, %v38_v18   ;;  %p549_p4 = pnand %p548_p3, %p542_p0 }
  0x12   :  { %500 = vmatmul.mubr.msk.f32.gmra.mxu0 %vm86_vm0, %v37_v17 }
  0x13   :  { %532 = vmatprep.mubr.msk.f32.mxu0 %vm565_vm2, %v564_v59 }
  0x14   :  { %249 = vperm.xlu0 %539, %v231_v19  }
  0x15   :  { %244 = vperm.xlu1 %540, %v230_v20  }
  0x18   :  { %239 = vperm.xlu0 %539, %v229_v21  }
  0x19   :  { %234 = vperm.xlu1 %540, %v228_v22  }
  0x7f   :  { %v84_v25 = vpop.permute.xlu0 %83 }
  0x80   :  { %v74_v27 = vpop.permute.xlu1 %73 }
  0x83   :  { %v79_v30 = vpop.permute.xlu0 %78 }
  0x84   :  { %v69_v32 = vpop.permute.xlu1 %68 }
  0x87   :  { %v64_v36 = vpop.permute.xlu0 %63 }
  0x88   :  { %v59_v41 = vpop.permute.xlu1 %58 }
  0x8b   :  { %v54_v46 = vpop.permute.xlu0 %53 }
  0x8c   :  { %v49_v49 = vpop.permute.xlu1 %48 }
  0x8f   :  { %v250_v60 = vpop.permute.xlu0 %249 }
  0x90   :  { %v245_v62 = vpop.permute.xlu1 %244 }
  0x93   :  { %v240_v2 = vpop.permute.xlu0 %239 }
  0x94   :  { %v235_v7 = vpop.permute.xlu1 %234 }
  0xc6   :  { %v492_v24 = vpop.f32.mrf.mxu0 }
  0xc7   :  { %v183_v50 = vadd.f32 %v492_v24, %v54_v46 }
  0xc8   :  { %v177_v26 = vpop.f32.mrf.mxu0 }
  0xc9   :  { %v178_v52 = vadd.f32 %v177_v26, %v49_v49  ;;  %v217_v54 = vmax.f32 %v183_v50, 0.0 }
  0xca   :  { %v495_v28 = vpop.f32.mrf.mxu0 }
  0xcb   :  { %v193_v44 = vadd.f32 %v495_v28, %v64_v36  ;;  %v216_v55 = vmax.f32 %v178_v52, 0.0 }
  0xcc   :  { %v187_v29 = vpop.f32.mrf.mxu0 }
  0xcd   :  { %v188_v47 = vadd.f32 %v187_v29, %v59_v41  ;;  %v219_v51 = vmax.f32 %v193_v44, 0.0 }
  0xce   :  { %v498_v31 = vpop.f32.mrf.mxu0 }
  0xcf   :  { %v203_v38 = vadd.f32 %v498_v31, %v74_v27  ;;  %v218_v53 = vmax.f32 %v188_v47, 0.0 }
  0xd0   :  { %v197_v33 = vpop.f32.mrf.mxu0 }
  0xd1   :  { %v198_v42 = vadd.f32 %v197_v33, %v69_v32  ;;  %v221_v45 = vmax.f32 %v203_v38, 0.0 }
  0xd2   :  { %v501_v34 = vpop.f32.mrf.mxu0 }
  0xd3   :  { %v213_v35 = vadd.f32 %v501_v34, %v84_v25  ;;  %v220_v48 = vmax.f32 %v198_v42, 0.0 }
  0xd4   :  { %v207_v37 = vpop.f32.mrf.mxu0 }
  0xd5   :  { %v223_v39 = vmax.f32 %v213_v35, 0.0  ;;  %v208_v40 = vadd.f32 %v207_v37, %v79_v30 }
  0xd7   :  { %v222_v43 = vmax.f32 %v208_v40, 0.0  ;;  %502 = vmatprep.subr.mxu1 %v223_v39 }
  0xd8   :  { %503 = vmatpush3.msra.mxu1 %v223_v39 }
  0xd9   :  { %504 = vmatprep.subr.mxu1 %v222_v43 }
  0xda   :  { %505 = vmatpush3.msra.mxu1 %v222_v43 }
  0xdb   :  { %506 = vmatprep.subr.mxu1 %v221_v45 }
  0xdc   :  { %507 = vmatpush3.msra.mxu1 %v221_v45 }
  0xdd   :  { %508 = vmatprep.subr.mxu1 %v220_v48 }
  0xde   :  { %509 = vmatpush3.msra.mxu1 %v220_v48 }
  0xdf   :  { %510 = vmatprep.subr.mxu1 %v219_v51 }
  0xe0   :  { %511 = vmatpush3.msra.mxu1 %v219_v51 }
  0xe1   :  { %512 = vmatprep.subr.mxu1 %v218_v53 }
  0xe2   :  { %513 = vmatpush3.msra.mxu1 %v218_v53 }
  0xe3   :  { %514 = vmatprep.subr.mxu1 %v217_v54 }
  0xe4   :  { %515 = vmatpush3.msra.mxu1 %v217_v54 }
  0xe5   :  { %516 = vmatprep.subr.mxu1 %v216_v55 }
  0xe6   :  { %517 = vmatpush3.msra.mxu1 %v216_v55 }
  0xe7   :  { %519 = vmatmul.mubr.msk.f32.vlgmr.msra.gmra.mxu1 %vm252_vm1, %v225_v56 }
  0xe8   :  { %521 = vmatprep.mubr.msk.f32.mxu1 %vm252_vm1, %v226_v57 }
  0xeb   :  { %522 = vmatmul.mubr.msk.f32.gmra.mxu1 %vm252_vm1, %v227_v58 }
 0x1a7   :  { %v520_v61 = vpop.f32.mrf.mxu1 }
 0x1a8   :  { %v337_v4 = vadd.f32 %v520_v61, %v240_v2 }
 0x1a9   :  { %v331_v63 = vpop.f32.mrf.mxu1 }
 0x1aa   :  { %v332_v8 = vadd.f32 %v331_v63, %v235_v7  ;;  %v351_v10 = vmax.f32 %v337_v4, 0.0 }
 0x1ab   :  { %v523_v0 = vpop.f32.mrf.mxu1 }
 0x1ac   :  { %v347_v1 = vadd.f32 %v523_v0, %v250_v60  ;;  %v350_v11 = vmax.f32 %v332_v8, 0.0 }
 0x1ad   :  { %v341_v3 = vpop.f32.mrf.mxu1 }
 0x1ae   :  { %v353_v5 = vmax.f32 %v347_v1, 0.0  ;;  %v342_v6 = vadd.f32 %v341_v3, %v245_v62 }
 0x1b0   :  { %v352_v9 = vmax.f32 %v342_v6, 0.0  ;;  %525 = vmatpush3.msra.mxu0 %v353_v5 }
 0x1b1   :  { %526 = vmatprep.subr.mxu0 %v564_v59 }
 0x1b2   :  { %527 = vmatpush3.msra.mxu0 %v352_v9 }
 0x1b3   :  { %528 = vmatprep.subr.mxu0 %v564_v59 }
 0x1b4   :  { %529 = vmatpush3.msra.mxu0 %v351_v10 }
 0x1b5   :  { %530 = vmatprep.subr.mxu0 %v564_v59 }
 0x1b6   :  { %531 = vmatpush3.msra.mxu0 %v350_v11 }
 0x1b7   :  { %533 = vmatmul.mubr.msk.f32.vlgmr.msra.gmra.mxu0 %vm357_vm3, %v354_v12 }
 0x277   :  { %v427_v14 = vpop.f32.mrf.mxu0 }
 0x278   :  { %v428_v15 = vadd.f32 %v427_v14, %v356_v13 }
 0x279   :  { %v534_v16 = vpop.f32.mrf.mxu0 }
 0x27a   :  { %431 = vst [vmem:[#allocation3] sm:$0x1] %v428_v15 }
 0x27b   :  { %552 = shalt.err (!%p549_p4)
}
 0x27c   :  { %441 = dma.vmem_to_hbm [thread:$0]  %s439_s29, 16, %s713_s7, [#allocation4]  }
 0x27d   :  { %561 = dma.done.wait [#allocation4], 16  }
 0x27e   :  { %562 = vsyncadd [#allocation4], 4294967280 }
 0x27f   :  { %445 = vsyncpa [#allocation4], 1 }

</bundles_post_ra>
